<compile_context>
chip_gen: v7x
topology: tpu7x:2x2x1
jax: 0.10.0
libtpu: 0.0.40
codegen_flags: <defaults>
</compile_context>

<pallas_src>
import jax
import jax.numpy as jnp
from jax.experimental import pallas as pl
from jax.experimental.pallas import tpu as pltpu


def _round_up(x: int, m: int) -> int:
    return ((x + m - 1) // m) * m


def edge_decoder_kernel(ue_ref, ie_ref,
                        w1u_ref, b1u_ref, w2u_ref, b2u_ref,
                        w1i_ref, b1i_ref, w2i_ref, b2i_ref,
                        out_ref):
    """One edge tile: per-side 2-layer MLP transform + product-reduce score.

    ue_ref/ie_ref : [H_pad, TILE_E] bf16  gathered user/item embeddings (edges on lanes)
    w*_ref        : [H_pad, H_pad]  bf16  transposed Linear weights (y_col = W.T @ x_col)
    b*_ref        : [H_pad, 1]      f32
    out_ref       : [1, TILE_E]     f32   lane-dense scores
    """
    def transform(x_ref, w1, b1, w2, b2):
        h = jnp.dot(w1[...], x_ref[...], preferred_element_type=jnp.float32) + b1[...]
        h = jnp.maximum(h, 0.0)          # ReLU; Dropout(0.2) is identity in eval mode
        return jnp.dot(w2[...], h.astype(jnp.bfloat16),
                       preferred_element_type=jnp.float32) + b2[...]

    tu = transform(ue_ref, w1u_ref, b1u_ref, w2u_ref, b2u_ref)
    ti = transform(ie_ref, w1i_ref, b1i_ref, w2i_ref, b2i_ref)
    # (user_transformed * item_transformed).sum(hidden) -> [1, TILE_E].
    out_ref[...] = jnp.sum(tu * ti, axis=0, keepdims=True)


def pack_edge_decoder_params(params, hidden):
    """One-time packing (hoisted out of the forward path): transpose, zero-pad
    hidden -> H_pad (multiple of 16 for bf16 sublane alignment), bf16 weights."""
    h_pad = max(16, _round_up(hidden, 16))

    def w(p):   # params store W with y = x @ W ; kernel computes y_col = W.T @ x_col
        out = jnp.zeros((h_pad, h_pad), jnp.float32).at[:hidden, :hidden].set(p.T)
        return out.astype(jnp.bfloat16)

    def b(p):
        return jnp.zeros((h_pad, 1), jnp.float32).at[:hidden, 0].set(p.reshape(-1))

    return {
        "w1u": w(params["w1u"]), "b1u": b(params["b1u"]),
        "w2u": w(params["w2u"]), "b2u": b(params["b2u"]),
        "w1i": w(params["w1i"]), "b1i": b(params["b1i"]),
        "w2i": w(params["w2i"]), "b2i": b(params["b2i"]),
    }


def _choose_tile_e(n_edges: int, h_pad: int) -> int:
    """Large edge tiles for HBM efficiency, bounded by VMEM and v7x megacore."""
    e128 = _round_up(max(n_edges, 1), 128)
    # Per lane, per pipeline buffer: two bf16 slabs (h_pad rows) + f32 scores;
    # the Pallas pipeline double-buffers each streamed array.
    per_lane = 2 * (2 * h_pad * 2 + 4)
    budget = 16 * 1024 * 1024          # streamed set well under v7x 32 MiB scoped VMEM
    cap = max(128, (budget // per_lane) // 128 * 128)
    tile = min(8192, cap, e128)
    if e128 >= 256:                    # guarantee >= 2 grid steps for the 2 v7x TCs
        tile = min(tile, _round_up(e128 // 2, 128))
    return max(tile, 128)


def edge_decoder_forward(z_dict, edge_label_index, packed):
    """Wrapper: cheap table prep + axis-1 gather (plain JAX), fused transform/score kernel."""
    row, col = edge_label_index[0], edge_label_index[1]
    E = row.shape[0]
    if E == 0:
        return jnp.zeros((0,), jnp.float32)

    H = z_dict["user"].shape[-1]
    h_pad = packed["w1u"].shape[0]

    tile_e = _choose_tile_e(E, h_pad)
    e_pad = _round_up(E, tile_e)
    grid = (e_pad // tile_e,)

    # Pre-transpose the (small) node tables once and gather along axis=1 so the
    # [H_pad, E_pad] slabs come out directly edge-lane-dense: no transpose or
    # concat of the big edge slab, and bf16 halves its HBM traffic. E is padded
    # with index 0 (a valid row); padded scores are sliced off below.
    row_p = jnp.pad(row, (0, e_pad - E))
    col_p = jnp.pad(col, (0, e_pad - E))
    pad_h = ((0, h_pad - H), (0, 0))
    zu_t = jnp.pad(z_dict["user"].astype(jnp.bfloat16).T, pad_h)        # [H_pad, Nu]
    zi_t = jnp.pad(z_dict["restaurant"].astype(jnp.bfloat16).T, pad_h)  # [H_pad, Ni]
    ue_t = jnp.take(zu_t, row_p, axis=1)                                # [H_pad, E_pad]
    ie_t = jnp.take(zi_t, col_p, axis=1)                                # [H_pad, E_pad]

    edge_spec = pl.BlockSpec((h_pad, tile_e), lambda i: (0, i))
    # TODO(synk): if an xprof trace on v5e shows exposed DMA waits, use
    #   pipeline_mode=pl.Buffered(3) on edge_spec.
    w_spec = pl.BlockSpec((h_pad, h_pad), lambda i: (0, 0))   # VMEM-resident weights
    b_spec = pl.BlockSpec((h_pad, 1), lambda i: (0, 0))       # VMEM-resident biases

    flops = 2 * 4 * h_pad * h_pad * e_pad          # four [H,H] x [H,E] dots actually issued
    bytes_accessed = (2 * h_pad * e_pad * 2        # two bf16 edge slabs, read once
                      + 4 * h_pad * h_pad * 2      # bf16 weights
                      + 4 * h_pad * 4              # f32 biases
                      + e_pad * 4)                 # f32 scores

    scores = pl.pallas_call(
        edge_decoder_kernel,
        out_shape=jax.ShapeDtypeStruct((1, e_pad), jnp.float32),
        grid=grid,
        in_specs=[edge_spec, edge_spec,
                  w_spec, b_spec, w_spec, b_spec,
                  w_spec, b_spec, w_spec, b_spec],
        out_specs=pl.BlockSpec((1, tile_e), lambda i: (0, i)),
        compiler_params=pltpu.CompilerParams(
            dimension_semantics=("parallel",),
            vmem_limit_bytes=32 * 1024 * 1024),
        cost_estimate=pl.CostEstimate(
            flops=flops, transcendentals=0, bytes_accessed=bytes_accessed),
    )(ue_t, ie_t,
      packed["w1u"], packed["b1u"], packed["w2u"], packed["b2u"],
      packed["w1i"], packed["b1i"], packed["w2i"], packed["b2i"])

    return scores[0, :E]


def init_params(key, hidden):
    """Deterministic init mimicking PyTorch Linear default (uniform +/- 1/sqrt(fan_in))."""
    ks = jax.random.split(key, 8)
    bound = 1.0 / jnp.sqrt(hidden)
    u = lambda k, shape: jax.random.uniform(k, shape, jnp.float32, -bound, bound)
    return {
        "w1u": u(ks[0], (hidden, hidden)), "b1u": u(ks[1], (1, hidden)),
        "w2u": u(ks[2], (hidden, hidden)), "b2u": u(ks[3], (1, hidden)),
        "w1i": u(ks[4], (hidden, hidden)), "b1i": u(ks[5], (1, hidden)),
        "w2i": u(ks[6], (hidden, hidden)), "b2i": u(ks[7], (1, hidden)),
    }


def reference_forward(z_dict, edge_label_index, p):
    """Pure-JAX reference mirroring the kernel numerics (bf16 streams, f32 math)."""
    f32 = lambda a: a.astype(jnp.bfloat16).astype(jnp.float32)
    row, col = edge_label_index[0], edge_label_index[1]
    ue = f32(z_dict["user"])[row]
    ie = f32(z_dict["restaurant"])[col]
    hu = jnp.maximum(ue @ f32(p["w1u"]) + p["b1u"], 0.0)
    u_t = f32(hu) @ f32(p["w2u"]) + p["b2u"]
    hi = jnp.maximum(ie @ f32(p["w1i"]) + p["b1i"], 0.0)
    i_t = f32(hi) @ f32(p["w2i"]) + p["b2i"]
    return jnp.sum(u_t * i_t, axis=-1)


if __name__ == "__main__":
    hidden = 32
    n_users, n_items, n_edges = 16, 16, 8

    key = jax.random.PRNGKey(0)
    k_u, k_i, k_e, k_p = jax.random.split(key, 4)

    z_dict = {
        "user": jax.random.normal(k_u, (n_users, hidden), jnp.float32),
        "restaurant": jax.random.normal(k_i, (n_items, hidden), jnp.float32),
    }
    edge_label_index = jnp.stack([
        jax.random.randint(k_e, (n_edges,), 0, n_users),
        jax.random.randint(jax.random.fold_in(k_e, 1), (n_edges,), 0, n_items),
    ])  # [2, E]

    params = init_params(k_p, hidden)
    packed = pack_edge_decoder_params(params, hidden)   # one-time, hoisted packing

    fwd = jax.jit(edge_decoder_forward)
    scores = jax.block_until_ready(fwd(z_dict, edge_label_index, packed))

    ref = reference_forward(z_dict, edge_label_index, params)
    assert scores.shape == (n_edges,)
    assert jnp.allclose(scores, ref, atol=1e-2, rtol=1e-2), (
        f"max abs diff: {jnp.max(jnp.abs(scores - ref))}")

    print("KERNEL_OK")
</pallas_src>

<mosaic_0001>
module attributes {stable_mosaic.version = 11 : i64} {
  func.func @edge_decoder_kernel(%arg0: i32, %arg1: memref<32x128xbf16, #tpu.memory_space<vmem>>, %arg2: memref<32x128xbf16, #tpu.memory_space<vmem>>, %arg3: memref<32x32xbf16, #tpu.memory_space<vmem>>, %arg4: memref<32x1xf32, #tpu.memory_space<vmem>>, %arg5: memref<32x32xbf16, #tpu.memory_space<vmem>>, %arg6: memref<32x1xf32, #tpu.memory_space<vmem>>, %arg7: memref<32x32xbf16, #tpu.memory_space<vmem>>, %arg8: memref<32x1xf32, #tpu.memory_space<vmem>>, %arg9: memref<32x32xbf16, #tpu.memory_space<vmem>>, %arg10: memref<32x1xf32, #tpu.memory_space<vmem>>, %arg11: memref<1x128xf32, #tpu.memory_space<vmem>>) attributes {dimension_semantics = [#tpu.dimension_semantics<parallel>], iteration_bounds = array<i64: 1>, scalar_prefetch = 0 : i64, scratch_operands = 0 : i64, tpu.core_type = #tpu.core_type<tc>, window_params = [{transform_indices = @transform_0, window_bounds = array<i64: 32, 128>}, {transform_indices = @transform_1, window_bounds = array<i64: 32, 128>}, {pipeline_mode = #tpu.pipeline_mode<synchronous>, transform_indices = @transform_2, window_bounds = array<i64: 32, 32>}, {pipeline_mode = #tpu.pipeline_mode<synchronous>, transform_indices = @transform_3, window_bounds = array<i64: 32, 1>}, {pipeline_mode = #tpu.pipeline_mode<synchronous>, transform_indices = @transform_4, window_bounds = array<i64: 32, 32>}, {pipeline_mode = #tpu.pipeline_mode<synchronous>, transform_indices = @transform_5, window_bounds = array<i64: 32, 1>}, {pipeline_mode = #tpu.pipeline_mode<synchronous>, transform_indices = @transform_6, window_bounds = array<i64: 32, 32>}, {pipeline_mode = #tpu.pipeline_mode<synchronous>, transform_indices = @transform_7, window_bounds = array<i64: 32, 1>}, {pipeline_mode = #tpu.pipeline_mode<synchronous>, transform_indices = @transform_8, window_bounds = array<i64: 32, 32>}, {pipeline_mode = #tpu.pipeline_mode<synchronous>, transform_indices = @transform_9, window_bounds = array<i64: 32, 1>}, {transform_indices = @transform_10, window_bounds = array<i64: 1, 128>}]} {
    %c0 = arith.constant 0 : index
    %c0_0 = arith.constant 0 : index
    %0 = vector.load %arg3[%c0, %c0_0] : memref<32x32xbf16, #tpu.memory_space<vmem>>, vector<32x32xbf16>
    %c0_1 = arith.constant 0 : index
    %c0_2 = arith.constant 0 : index
    %1 = vector.load %arg1[%c0_1, %c0_2] : memref<32x128xbf16, #tpu.memory_space<vmem>>, vector<32x128xbf16>
    %cst = arith.constant dense<0.000000e+00> : vector<32x128xf32>
    %2 = tpu.matmul %0, %1, %cst {dimension_numbers = #tpu.dot_dimension_numbers<[1], [0], [0], [1], [0, 0, 1, 1], [], []>} : vector<32x32xbf16>, vector<32x128xbf16>, vector<32x128xf32> -> vector<32x128xf32>
    %c0_3 = arith.constant 0 : index
    %c0_4 = arith.constant 0 : index
    %3 = vector.load %arg4[%c0_3, %c0_4] : memref<32x1xf32, #tpu.memory_space<vmem>>, vector<32x1xf32>
    %4 = vector.broadcast %3 : vector<32x1xf32> to vector<32x128xf32>
    %5 = arith.addf %2, %4 : vector<32x128xf32>
    %cst_5 = arith.constant 0.000000e+00 : f32
    %6 = vector.broadcast %cst_5 : f32 to vector<32x128xf32>
    %7 = arith.maximumf %5, %6 : vector<32x128xf32>
    %c0_6 = arith.constant 0 : index
    %c0_7 = arith.constant 0 : index
    %8 = vector.load %arg5[%c0_6, %c0_7] : memref<32x32xbf16, #tpu.memory_space<vmem>>, vector<32x32xbf16>
    %9 = arith.truncf %7 : vector<32x128xf32> to vector<32x128xbf16>
    %cst_8 = arith.constant dense<0.000000e+00> : vector<32x128xf32>
    %10 = tpu.matmul %8, %9, %cst_8 {dimension_numbers = #tpu.dot_dimension_numbers<[1], [0], [0], [1], [0, 0, 1, 1], [], []>} : vector<32x32xbf16>, vector<32x128xbf16>, vector<32x128xf32> -> vector<32x128xf32>
    %c0_9 = arith.constant 0 : index
    %c0_10 = arith.constant 0 : index
    %11 = vector.load %arg6[%c0_9, %c0_10] : memref<32x1xf32, #tpu.memory_space<vmem>>, vector<32x1xf32>
    %12 = vector.broadcast %11 : vector<32x1xf32> to vector<32x128xf32>
    %13 = arith.addf %10, %12 : vector<32x128xf32>
    %c0_11 = arith.constant 0 : index
    %c0_12 = arith.constant 0 : index
    %14 = vector.load %arg7[%c0_11, %c0_12] : memref<32x32xbf16, #tpu.memory_space<vmem>>, vector<32x32xbf16>
    %c0_13 = arith.constant 0 : index
    %c0_14 = arith.constant 0 : index
    %15 = vector.load %arg2[%c0_13, %c0_14] : memref<32x128xbf16, #tpu.memory_space<vmem>>, vector<32x128xbf16>
    %cst_15 = arith.constant dense<0.000000e+00> : vector<32x128xf32>
    %16 = tpu.matmul %14, %15, %cst_15 {dimension_numbers = #tpu.dot_dimension_numbers<[1], [0], [0], [1], [0, 0, 1, 1], [], []>} : vector<32x32xbf16>, vector<32x128xbf16>, vector<32x128xf32> -> vector<32x128xf32>
    %c0_16 = arith.constant 0 : index
    %c0_17 = arith.constant 0 : index
    %17 = vector.load %arg8[%c0_16, %c0_17] : memref<32x1xf32, #tpu.memory_space<vmem>>, vector<32x1xf32>
    %18 = vector.broadcast %17 : vector<32x1xf32> to vector<32x128xf32>
    %19 = arith.addf %16, %18 : vector<32x128xf32>
    %cst_18 = arith.constant 0.000000e+00 : f32
    %20 = vector.broadcast %cst_18 : f32 to vector<32x128xf32>
    %21 = arith.maximumf %19, %20 : vector<32x128xf32>
    %c0_19 = arith.constant 0 : index
    %c0_20 = arith.constant 0 : index
    %22 = vector.load %arg9[%c0_19, %c0_20] : memref<32x32xbf16, #tpu.memory_space<vmem>>, vector<32x32xbf16>
    %23 = arith.truncf %21 : vector<32x128xf32> to vector<32x128xbf16>
    %cst_21 = arith.constant dense<0.000000e+00> : vector<32x128xf32>
    %24 = tpu.matmul %22, %23, %cst_21 {dimension_numbers = #tpu.dot_dimension_numbers<[1], [0], [0], [1], [0, 0, 1, 1], [], []>} : vector<32x32xbf16>, vector<32x128xbf16>, vector<32x128xf32> -> vector<32x128xf32>
    %c0_22 = arith.constant 0 : index
    %c0_23 = arith.constant 0 : index
    %25 = vector.load %arg10[%c0_22, %c0_23] : memref<32x1xf32, #tpu.memory_space<vmem>>, vector<32x1xf32>
    %26 = vector.broadcast %25 : vector<32x1xf32> to vector<32x128xf32>
    %27 = arith.addf %24, %26 : vector<32x128xf32>
    %28 = arith.mulf %13, %27 : vector<32x128xf32>
    %cst_24 = arith.constant dense<0.000000e+00> : vector<128xf32>
    %29 = vector.multi_reduction <add>, %28, %cst_24 [0] : vector<32x128xf32> to vector<128xf32>
    %30 = vector.shape_cast %29 : vector<128xf32> to vector<1x128xf32>
    %c0_25 = arith.constant 0 : index
    %c0_26 = arith.constant 0 : index
    %31 = vector.load %arg11[%c0_25, %c0_26] : memref<1x128xf32, #tpu.memory_space<vmem>>, vector<1x128xf32>
    tpu.vector_store %arg11[%c0_25, %c0_26], %30 {strides = array<i32>} : memref<1x128xf32, #tpu.memory_space<vmem>>, vector<1x128xf32>,
    return
  }
  func.func @transform_0(%arg0: i32) -> (i32, i32) {
    %c0_i32 = arith.constant 0 : i32
    %c0_i32_0 = arith.constant 0 : i32
    return %c0_i32, %arg0 : i32, i32
  }
  func.func @transform_1(%arg0: i32) -> (i32, i32) {
    %c0_i32 = arith.constant 0 : i32
    %c0_i32_0 = arith.constant 0 : i32
    return %c0_i32, %arg0 : i32, i32
  }
  func.func @transform_2(%arg0: i32) -> (i32, i32) {
    %c0_i32 = arith.constant 0 : i32
    %c0_i32_0 = arith.constant 0 : i32
    %c0_i32_1 = arith.constant 0 : i32
    return %c0_i32, %c0_i32_0 : i32, i32
  }
  func.func @transform_3(%arg0: i32) -> (i32, i32) {
    %c0_i32 = arith.constant 0 : i32
    %c0_i32_0 = arith.constant 0 : i32
    %c0_i32_1 = arith.constant 0 : i32
    return %c0_i32, %c0_i32_0 : i32, i32
  }
  func.func @transform_4(%arg0: i32) -> (i32, i32) {
    %c0_i32 = arith.constant 0 : i32
    %c0_i32_0 = arith.constant 0 : i32
    %c0_i32_1 = arith.constant 0 : i32
    return %c0_i32, %c0_i32_0 : i32, i32
  }
  func.func @transform_5(%arg0: i32) -> (i32, i32) {
    %c0_i32 = arith.constant 0 : i32
    %c0_i32_0 = arith.constant 0 : i32
    %c0_i32_1 = arith.constant 0 : i32
    return %c0_i32, %c0_i32_0 : i32, i32
  }
  func.func @transform_6(%arg0: i32) -> (i32, i32) {
    %c0_i32 = arith.constant 0 : i32
    %c0_i32_0 = arith.constant 0 : i32
    %c0_i32_1 = arith.constant 0 : i32
    return %c0_i32, %c0_i32_0 : i32, i32
  }
  func.func @transform_7(%arg0: i32) -> (i32, i32) {
    %c0_i32 = arith.constant 0 : i32
    %c0_i32_0 = arith.constant 0 : i32
    %c0_i32_1 = arith.constant 0 : i32
    return %c0_i32, %c0_i32_0 : i32, i32
  }
  func.func @transform_8(%arg0: i32) -> (i32, i32) {
    %c0_i32 = arith.constant 0 : i32
    %c0_i32_0 = arith.constant 0 : i32
    %c0_i32_1 = arith.constant 0 : i32
    return %c0_i32, %c0_i32_0 : i32, i32
  }
  func.func @transform_9(%arg0: i32) -> (i32, i32) {
    %c0_i32 = arith.constant 0 : i32
    %c0_i32_0 = arith.constant 0 : i32
    %c0_i32_1 = arith.constant 0 : i32
    return %c0_i32, %c0_i32_0 : i32, i32
  }
  func.func @transform_10(%arg0: i32) -> (i32, i32) {
    %c0_i32 = arith.constant 0 : i32
    %c0_i32_0 = arith.constant 0 : i32
    return %c0_i32, %arg0 : i32, i32
  }
}

</mosaic_0001>

<bundles_post_ra>
// kernel: edge_decoder_forward.1
= control target key start
LH: loop header
LB: loop body
LE: loop exit
PB: predicated region body
PF: predicated region fallthrough
CT: control target
= control target key end

     0   :  { %v554_v1 = vmov 0   ;;  %vm90_vm0 = vcmask 261120   ;;  %s705_s0 = inlined_call_operand.vmem [shape: bf16[32,128], index: 0, kind: input, shape index: {}]   ;;  %s706_s2 = inlined_call_operand.vmem [shape: bf16[32,32], index: 2, kind: input, shape index: {}]   ;;  %s707_s1 = inlined_call_operand.vmem [shape: bf16[32,128], index: 1, kind: input, shape index: {}]   ;;  %s708_s6 = inlined_call_operand.vmem [shape: bf16[32,32], index: 6, kind: input, shape index: {}]   ;;  %s709_s3 = inlined_call_operand.vmem [shape: f32[32,1], index: 3, kind: input, shape index: {}]   ;;  %s710_s7 = inlined_call_operand.vmem [shape: f32[32,1], index: 7, kind: input, shape index: {}]   ;;  %s711_s5 = inlined_call_operand.vmem [shape: f32[32,1], index: 5, kind: input, shape index: {}]   ;;  %s712_s9 = inlined_call_operand.vmem [shape: f32[32,1], index: 9, kind: input, shape index: {}]   ;;  %s713_s4 = inlined_call_operand.vmem [shape: bf16[32,32], index: 4, kind: input, shape index: {}]   ;;  %s714_s8 = inlined_call_operand.vmem [shape: bf16[32,32], index: 8, kind: input, shape index: {}]   ;;  %s715_s10 = inlined_call_operand.vmem [shape: f32[1,128], index: 10, kind: output, shape index: {}]  }
   0x1   :  { %v542_v0 = vld [vmem:[%s705_s0] sm:$0xff]   ;;  %540 = vset.pattern.permute.xlu0 %v554_v1  ;;  %541 = vset.pattern.permute.xlu1 %v554_v1  ;;  %v543_v2 = vld [vmem:[%s705_s0 + $0x8] sm:$0xff]   ;;  %v46_v9 = vld [vmem:[%s709_s3 + $0x10] sm:$0xff] }
   0x2   :  { %507 = vmatprep.subr.bf16.mxu0 %v542_v0  ;;  %v544_v3 = vld [vmem:[%s706_s2] sm:$0xff]   ;;  %v545_v5 = vld [vmem:[%s706_s2 + $0x8] sm:$0xff]   ;;  %60 = vperm.xlu1 %541, %v46_v9   ;;  %v47_v11 = vld [vmem:[%s709_s3 + $0x18] sm:$0xff] }
   0x3   :  { %508 = vmatpush3.bf16.msra.mxu0 %v542_v0  ;;  %511 = vmatprep.mubr.msk.bf16.mxu0 %vm90_vm0, %v544_v3  ;;  %v546_v4 = vld [vmem:[%s707_s1] sm:$0xff]   ;;  %v547_v7 = vld [vmem:[%s707_s1 + $0x8] sm:$0xff]   ;;  %v255_v15 = vld [vmem:[%s710_s7 + $0x10] sm:$0xff] }
   0x4   :  { %509 = vmatprep.subr.bf16.mxu0 %v543_v2  ;;  %v548_v6 = vld [vmem:[%s708_s6] sm:$0xff]   ;;  %v45_v10 = vld [vmem:[%s709_s3 + $0x8] sm:$0xff]  ;;  %v256_v16 = vld [vmem:[%s710_s7 + $0x18] sm:$0xff] }
   0x5   :  { %v44_v8 = vld [vmem:[%s709_s3] sm:$0xff]  ;;  %v549_v12 = vld [vmem:[%s708_s6 + $0x8] sm:$0xff]   ;;  %v158_v21 = vld [vmem:[%s711_s5 + $0x10] sm:$0xff] }
   0x6   :  { %50 = vperm.xlu0 %540, %v44_v8   ;;  %65 = vperm.xlu1 %541, %v47_v11   ;;  %v253_v13 = vld [vmem:[%s710_s7] sm:$0xff]  ;;  %v254_v14 = vld [vmem:[%s710_s7 + $0x8] sm:$0xff]  ;;  %v366_v22 = vld [vmem:[%s712_s9 + $0x10] sm:$0xff] }
   0x7   :  { %510 = vmatpush3.bf16.msra.mxu0 %v543_v2  ;;  %v156_v17 = vld [vmem:[%s711_s5] sm:$0xff]  ;;  %v157_v18 = vld [vmem:[%s711_s5 + $0x8] sm:$0xff]  ;;  %v159_v23 = vld [vmem:[%s711_s5 + $0x18] sm:$0xff] }
   0x8   :  { %523 = vmatprep.subr.bf16.mxu0 %v546_v4  ;;  %v364_v19 = vld [vmem:[%s712_s9] sm:$0xff]  ;;  %v365_v20 = vld [vmem:[%s712_s9 + $0x8] sm:$0xff]  ;;  %v367_v24 = vld [vmem:[%s712_s9 + $0x18] sm:$0xff] }
   0x9   :  { %v550_v25 = vld [vmem:[%s713_s4] sm:$0xff]   ;;  %v551_v60 = vld [vmem:[%s713_s4 + $0x8] sm:$0xff]  }
   0xa   :  { %512 = vmatmul.mubr.msk.bf16.vlgmr.msra.gmra.mrb[0].mxu0 %vm90_vm0, %v545_v5  ;;  %55 = vperm.xlu0 %540, %v45_v10   ;;  %v552_v62 = vld [vmem:[%s714_s8] sm:$0xff]   ;;  %v553_v0 = vld [vmem:[%s714_s8 + $0x8] sm:$0xff]  }
   0xb   :  { %524 = vmatpush3.bf16.msra.mxu0 %v546_v4  ;;  %527 = vmatprep.mubr.msk.bf16.mxu0 %vm90_vm0, %v548_v6 }
   0xc   :  { %525 = vmatprep.subr.bf16.mxu0 %v547_v7  ;;  %264 = vperm.xlu1 %541, %v254_v14  }
   0xd   :  { %519 = vmatprep.mubr.msk.bf16.mxu1 %vm90_vm0, %v550_v25 }
   0xe   :  { %259 = vperm.xlu0 %540, %v253_v13  }
   0xf   :  { %526 = vmatpush3.bf16.msra.mxu0 %v547_v7 }
  0x10   :  { %274 = vperm.xlu1 %541, %v256_v16  }
  0x12   :  { %528 = vmatmul.mubr.msk.bf16.vlgmr.msra.gmra.mrb[4].mxu0 %vm90_vm0, %v549_v12  ;;  %269 = vperm.xlu0 %540, %v255_v15  }
  0x14   :  { %167 = vperm.xlu1 %541, %v157_v18  }
  0x16   :  { %162 = vperm.xlu0 %540, %v156_v17  }
  0x18   :  { %375 = vperm.xlu1 %541, %v365_v20  }
  0x1a   :  { %370 = vperm.xlu0 %540, %v364_v19  }
  0x1c   :  { %380 = vperm.xlu1 %541, %v366_v22  }
  0x1e   :  { %172 = vperm.xlu0 %540, %v158_v21  }
  0x20   :  { %385 = vperm.xlu1 %541, %v367_v24  }
  0x22   :  { %177 = vperm.xlu0 %540, %v159_v23  }
  0x81   :  { %v61_v27 = vpop.permute.xlu1 %60 }
  0x85   :  { %v51_v26 = vpop.permute.xlu0 %50  ;;  %v66_v29 = vpop.permute.xlu1 %65 }
  0x89   :  { %v56_v28 = vpop.permute.xlu0 %55 }
  0x8b   :  { %v265_v38 = vpop.permute.xlu1 %264 }
  0x8d   :  { %v260_v33 = vpop.permute.xlu0 %259 }
  0x8f   :  { %v275_v50 = vpop.permute.xlu1 %274 }
  0x91   :  { %v270_v45 = vpop.permute.xlu0 %269 }
  0x93   :  { %v168_v2 = vpop.permute.xlu1 %167 }
  0x95   :  { %v163_v1 = vpop.permute.xlu0 %162 }
  0x97   :  { %v376_v4 = vpop.permute.xlu1 %375 }
  0x99   :  { %v371_v3 = vpop.permute.xlu0 %370 }
  0x9b   :  { %v381_v10 = vpop.permute.xlu1 %380 }
  0x9d   :  { %v173_v8 = vpop.permute.xlu0 %172 }
  0x9f   :  { %v386_v16 = vpop.permute.xlu1 %385 }
  0xa1   :  { %v178_v12 = vpop.permute.xlu0 %177 }
  0xdd   :  { %v513_v30 = vpop.f32.mrb[0].mxu0 }
  0xde   :  { %v140_v31 = vadd.f32 %v513_v30, %v61_v27  ;;  %v131_v32 = vpop.f32.mrb[1].mxu0 }
  0xdf   :  { %v132_v34 = vadd.f32 %v131_v32, %v51_v26  ;;  %v514_v35 = vpop.f32.mrb[2].mxu0 }
  0xe0   :  { %v143_v36 = vadd.f32 %v514_v35, %v66_v29  ;;  %v134_v37 = vpop.f32.mrb[3].mxu0  ;;  %v148_v40 = vmax.f32 %v140_v31, 0.0 }
  0xe1   :  { %v135_v39 = vadd.f32 %v134_v37, %v56_v28  ;;  %v146_v42 = vmax.f32 %v132_v34, 0.0 }
  0xe2   :  { %v149_v41 = vmax.f32 %v143_v36, 0.0 }
  0xe3   :  { %v147_v43 = vmax.f32 %v135_v39, 0.0 }
  0xe4   :  { %v155_v44 = vpack.c.bf16 %v149_v41, %v148_v40 }
  0xe5   :  { %v529_v46 = vpop.f32.mrb[4].mxu0  ;;  %v154_v47 = vpack.c.bf16 %v147_v43, %v146_v42 }
  0xe6   :  { %v348_v48 = vadd.f32 %v529_v46, %v270_v45  ;;  %v339_v49 = vpop.f32.mrb[5].mxu0 }
  0xe7   :  { %v340_v51 = vadd.f32 %v339_v49, %v260_v33  ;;  %515 = vmatprep.subr.bf16.mxu1 %v154_v47  ;;  %v530_v52 = vpop.f32.mrb[6].mxu0 }
  0xe8   :  { %v351_v53 = vadd.f32 %v530_v52, %v275_v50  ;;  %516 = vmatpush3.bf16.msra.mxu1 %v154_v47  ;;  %v342_v54 = vpop.f32.mrb[7].mxu0  ;;  %v356_v56 = vmax.f32 %v348_v48, 0.0 }
  0xe9   :  { %v343_v55 = vadd.f32 %v342_v54, %v265_v38  ;;  %517 = vmatprep.subr.bf16.mxu1 %v155_v44  ;;  %v354_v58 = vmax.f32 %v340_v51, 0.0 }
  0xea   :  { %v357_v57 = vmax.f32 %v351_v53, 0.0 }
  0xeb   :  { %v355_v59 = vmax.f32 %v343_v55, 0.0 }
  0xec   :  { %v363_v61 = vpack.c.bf16 %v357_v57, %v356_v56  ;;  %518 = vmatpush3.bf16.msra.mxu1 %v155_v44 }
  0xed   :  { %v362_v63 = vpack.c.bf16 %v355_v59, %v354_v58 }
  0xef   :  { %520 = vmatmul.mubr.msk.bf16.vlgmr.msra.gmra.mrb[0].mxu1 %vm90_vm0, %v551_v60  ;;  %531 = vmatprep.subr.bf16.mxu1 %v362_v63 }
  0xf0   :  { %532 = vmatpush3.bf16.msra.mxu1 %v362_v63  ;;  %535 = vmatprep.mubr.msk.bf16.mxu1 %vm90_vm0, %v552_v62 }
  0xf1   :  { %533 = vmatprep.subr.bf16.mxu1 %v363_v61 }
  0xf4   :  { %534 = vmatpush3.bf16.msra.mxu1 %v363_v61 }
  0xf7   :  { %536 = vmatmul.mubr.msk.bf16.vlgmr.msra.gmra.mrb[4].mxu1 %vm90_vm0, %v553_v0 }
 0x1c2   :  { %v521_v5 = vpop.f32.mrb[0].mxu1 }
 0x1c3   :  { %v230_v6 = vpop.f32.mrb[1].mxu1  ;;  %v239_v13 = vadd.f32 %v521_v5, %v173_v8 }
 0x1c4   :  { %v522_v7 = vpop.f32.mrb[2].mxu1  ;;  %v231_v17 = vadd.f32 %v230_v6, %v163_v1 }
 0x1c5   :  { %v233_v9 = vpop.f32.mrb[3].mxu1  ;;  %v242_v20 = vadd.f32 %v522_v7, %v178_v12 }
 0x1c6   :  { %v234_v24 = vadd.f32 %v233_v9, %v168_v2 }
 0x1ca   :  { %v537_v11 = vpop.f32.mrb[4].mxu1 }
 0x1cb   :  { %v447_v14 = vadd.f32 %v537_v11, %v381_v10  ;;  %v438_v15 = vpop.f32.mrb[5].mxu1 }
 0x1cc   :  { %v439_v18 = vadd.f32 %v438_v15, %v371_v3  ;;  %v538_v19 = vpop.f32.mrb[6].mxu1 }
 0x1cd   :  { %v455_v21 = vmul.f32 %v447_v14, %v239_v13  ;;  %v450_v22 = vadd.f32 %v538_v19, %v386_v16  ;;  %v441_v23 = vpop.f32.mrb[7].mxu1 }
 0x1ce   :  { %v453_v25 = vmul.f32 %v439_v18, %v231_v17  ;;  %v442_v26 = vadd.f32 %v441_v23, %v376_v4 }
 0x1cf   :  { %v456_v27 = vmul.f32 %v450_v22, %v242_v20 }
 0x1d0   :  { %v454_v28 = vmul.f32 %v442_v26, %v234_v24 }
 0x1d2   :  { %v457_v29 = vadd.f32 %v454_v28, %v453_v25 }
 0x1d4   :  { %v458_v30 = vadd.f32 %v457_v29, %v455_v21 }
 0x1d6   :  { %v459_v31 = vadd.f32 %v458_v30, %v456_v27 }
 0x1d8   :  { %v460_v32 = vrot.slane %v459_v31, 4 }
 0x1da   :  { %v461_v33 = vadd.f32 %v460_v32, %v459_v31 }
 0x1dc   :  { %v462_v34 = vrot.slane %v461_v33, 2 }
 0x1de   :  { %v463_v35 = vadd.f32 %v462_v34, %v461_v33 }
 0x1e0   :  { %v464_v36 = vrot.slane %v463_v35, 1 }
 0x1e2   :  { %v465_v37 = vadd.f32 %v464_v36, %v463_v35 }
 0x1e4   :  { %466 = vst [vmem:[%s715_s10] sm:$0x1] %v465_v37 }

</bundles_post_ra>
